<compile_context>
chip_gen: v6e
topology: v6e:2x2x1
jax: 0.10.0
libtpu: 0.0.40
codegen_flags: <defaults>
</compile_context>

<pallas_src>
import math

import jax
import jax.numpy as jnp
from jax.experimental import pallas as pl
from jax.experimental.pallas import tpu as pltpu


def _round_up(n, m):
    return ((n + m - 1) // m) * m


# ---------------------------------------------------------------------------
# Static layout of the two packed weight slabs (shared by packer and kernel)
# ---------------------------------------------------------------------------
def _layout(NI, H, NM, K):
    TWO_NM, TWO_H, TWO_NMH = 2 * NM, 2 * H, 2 * NM * H
    OUT_W = max(128, _round_up(H + 1, 128))
    LW_A = TWO_NMH                               # lane width of slab A
    LW_B = max(OUT_W, _round_up(TWO_H, 128))     # lane width of slab B

    def offsets(sections):
        off, row = {}, 0
        for name, rows in sections:
            off[name] = row
            row += _round_up(rows, 8)            # keep sections sublane-aligned
        return off, row

    off_a, rows_a = offsets([("w_in", NI), ("b_in", 1), ("expand", TWO_NM)])
    off_b, rows_b = offsets([("w_out", TWO_NMH), ("b_out", TWO_NM),
                             ("proj", TWO_H), ("obias", 1),
                             ("att_w", K), ("att_b", 1), ("gsum", TWO_NM)])
    return off_a, rows_a, LW_A, off_b, rows_b, LW_B, OUT_W


# ---------------------------------------------------------------------------
# Fused kernel: phase -> att softmax -> both SwitchModules -> critic head
# ---------------------------------------------------------------------------
def _make_kernel(*, NI, H, NM, K, OUT_W, time_scale, off_a, off_b):
    TWO_NM, TWO_H, TWO_NMH = 2 * NM, 2 * H, 2 * NM * H

    def kernel(inp_ref, a_ref, b_ref, out_ref):
        x = inp_ref[...]                                   # [BT, NI]
        BT = x.shape[0]

        # -- zero-cost static views into the packed weight slabs --
        w_in = a_ref[off_a["w_in"]:off_a["w_in"] + NI, :]            # [NI, 2NMH]
        b_in = a_ref[off_a["b_in"]:off_a["b_in"] + 1, :]             # [1, 2NMH]
        expand = a_ref[off_a["expand"]:off_a["expand"] + TWO_NM, :]  # [2NM, 2NMH]

        w_out = b_ref[off_b["w_out"]:off_b["w_out"] + TWO_NMH, 0:TWO_H]
        b_out = b_ref[off_b["b_out"]:off_b["b_out"] + TWO_NM, 0:TWO_H]
        proj = b_ref[off_b["proj"]:off_b["proj"] + TWO_H, 0:OUT_W]
        obias = b_ref[off_b["obias"]:off_b["obias"] + 1, 0:OUT_W]
        att_w = b_ref[off_b["att_w"]:off_b["att_w"] + K, 0:TWO_NM]
        att_b = b_ref[off_b["att_b"]:off_b["att_b"] + 1, 0:TWO_NM]
        gsum = b_ref[off_b["gsum"]:off_b["gsum"] + TWO_NM, 0:TWO_NM]

        # -- phase -> one-hot -> per-branch softmax selection (all in-kernel) --
        step = jnp.floor(x[:, NI - 1:NI] / time_scale + 0.5)         # round
        phase = (step - K * jnp.floor(step / K)).astype(jnp.int32)   # step % K
        lane = jax.lax.broadcasted_iota(jnp.int32, (BT, K), 1)
        onehot = (lane == phase).astype(jnp.float32)                 # [BT, K]

        logits = (jnp.dot(onehot, att_w, preferred_element_type=jnp.float32)
                  + att_b)                                           # [BT, 2NM]
        # A shared per-row max shift cancels inside each branch's softmax.
        e = jnp.exp(logits - jnp.max(logits, axis=-1, keepdims=True))
        denom = jnp.dot(e, gsum, preferred_element_type=jnp.float32)  # group sums
        sel = e * pl.reciprocal(denom, approx=True)                   # [BT, 2NM]

        # -- both SwitchModules at once (actor lanes 0:NM*H, critic after) --
        # TODO(synk): num_layer > 2 would add more block-diagonal hidden layers
        # here; the demo config uses num_layer == 2.
        h = jnp.tanh(jnp.dot(x, w_in, preferred_element_type=jnp.float32)
                     + b_in)                                          # [BT, 2NMH]
        sel_lanes = jnp.dot(sel, expand,
                            preferred_element_type=jnp.float32)       # [BT, 2NMH]
        mixed = (jnp.dot(sel_lanes * h, w_out,
                         preferred_element_type=jnp.float32)
                 + jnp.dot(sel, b_out,
                           preferred_element_type=jnp.float32))       # [BT, 2H]

        # -- one lane-dense output: [ actor(0:H) | critic value(H) | zero pad ]
        out_ref[...] = (jnp.dot(jnp.tanh(mixed), proj,
                                preferred_element_type=jnp.float32) + obias)

    return kernel


# ---------------------------------------------------------------------------
# forward() factory (all config static, only arrays are traced)
# ---------------------------------------------------------------------------
def make_forward(*, num_inputs, hid_sz, num_modules, phase_period, time_scale,
                 use_timestep):
    del use_timestep  # handled entirely by the zero timestep row in w_in
    NI, H, NM, K = num_inputs, hid_sz, num_modules, phase_period
    off_a, rows_a, LW_A, off_b, rows_b, LW_B, OUT_W = _layout(NI, H, NM, K)
    kernel = _make_kernel(NI=NI, H=H, NM=NM, K=K, OUT_W=OUT_W,
                          time_scale=time_scale, off_a=off_a, off_b=off_b)

    def forward(packed, inputs, states, masks):
        del masks
        B = inputs.shape[0]
        # One block unless B is large; a parallel batch grid lets v7x's second
        # TensorCore help for big (vmapped-rollout) batches.
        BT = 512 if (B > 512 and B % 512 == 0) else B
        grid = (B // BT,)
        out = pl.pallas_call(
            kernel,
            out_shape=jax.ShapeDtypeStruct((B, OUT_W), jnp.float32),
            grid=grid,
            in_specs=[
                pl.BlockSpec((BT, NI), lambda i: (i, 0)),
                pl.BlockSpec((rows_a, LW_A), lambda i: (0, 0)),
                pl.BlockSpec((rows_b, LW_B), lambda i: (0, 0)),
            ],
            out_specs=pl.BlockSpec((BT, OUT_W), lambda i: (i, 0)),
            compiler_params=pltpu.CompilerParams(
                dimension_semantics=("parallel",)),
        )(inputs, packed["slab_a"], packed["slab_b"])
        hidden_actor = out[:, :H]
        hidden_critic = out[:, H:H + 1]
        return hidden_critic, hidden_actor, states

    return forward


# ---------------------------------------------------------------------------
# Parameter construction (PyTorch layout) + one-time packing to kernel layout
# ---------------------------------------------------------------------------
def init_switch_module_params(key, input_sz, hid_sz, num_modules, switch_sz):
    k = jax.random.split(key, 6)
    stdv_in = 1.0 / math.sqrt(hid_sz)
    stdv_att = 1.0 / math.sqrt(switch_sz)
    u = lambda kk, shape, s: jax.random.uniform(kk, shape, jnp.float32, -s, s)
    return {
        "w_in":  u(k[0], (num_modules, hid_sz, input_sz), stdv_in),
        "b_in":  u(k[1], (num_modules, hid_sz), stdv_in),
        "w_out": u(k[2], (num_modules, hid_sz, hid_sz), stdv_in),
        "b_out": u(k[3], (num_modules, hid_sz), stdv_in),
        "att_w": u(k[4], (num_modules, switch_sz), stdv_att),
        "att_b": u(k[5], (num_modules,), stdv_att),
    }


def init_model_params(key, num_inputs, hid_sz, num_modules, phase_period,
                      use_timestep):
    obs_sz = num_inputs if use_timestep else num_inputs - 1
    k_actor, k_critic, k_cout = jax.random.split(key, 3)
    stdv_c = 1.0 / math.sqrt(hid_sz)
    return {
        "actor": init_switch_module_params(
            k_actor, obs_sz, hid_sz, num_modules, phase_period),
        "critic": init_switch_module_params(
            k_critic, obs_sz, hid_sz, num_modules, phase_period),
        "critic_out_w": jax.random.uniform(
            k_cout, (1, hid_sz), jnp.float32, -stdv_c, stdv_c),
        "critic_out_b": jnp.zeros((1,), jnp.float32),
    }


def pack_model_params(params, *, num_inputs, use_timestep):
    """One-time packing of all weights into 2 lane-dense slabs (3 DMAs total)."""
    actor, critic = params["actor"], params["critic"]
    NM, H, D = actor["w_in"].shape
    K = actor["att_w"].shape[1]
    NI = num_inputs
    TWO_NM, TWO_H, TWO_NMH = 2 * NM, 2 * H, 2 * NM * H
    off_a, rows_a, LW_A, off_b, rows_b, LW_B, OUT_W = _layout(NI, H, NM, K)
    assert D == (NI if use_timestep else NI - 1)

    # ---- slab A (lane width 2*NM*H): in_fc weights + bias + selection expander
    def pack_in(p):                       # [NM,H,D] -> [D, NM*H]
        return jnp.transpose(p["w_in"], (2, 0, 1)).reshape(D, NM * H)

    w_in = jnp.concatenate([pack_in(actor), pack_in(critic)], axis=1)  # [D,2NMH]
    b_in = jnp.concatenate([actor["b_in"].reshape(1, -1),
                            critic["b_in"].reshape(1, -1)], axis=1)
    expand = jnp.repeat(jnp.eye(TWO_NM, dtype=jnp.float32), H, axis=1)

    slab_a = jnp.zeros((rows_a, LW_A), jnp.float32)
    # Rows D..NI-1 stay zero: the timestep column contributes nothing when
    # use_timestep is False, so the kernel can matmul the full `inputs`.
    slab_a = slab_a.at[off_a["w_in"]:off_a["w_in"] + D, :].set(w_in)
    slab_a = slab_a.at[off_a["b_in"], :].set(b_in[0])
    slab_a = slab_a.at[off_a["expand"]:off_a["expand"] + TWO_NM, :].set(expand)

    # ---- slab B (lane width 128): folded out_fc + biases + head + att + gsum
    w_out = jnp.zeros((TWO_NMH, TWO_H), jnp.float32)
    b_out = jnp.zeros((TWO_NM, TWO_H), jnp.float32)
    for m in range(NM):
        w_out = w_out.at[m * H:(m + 1) * H, 0:H].set(actor["w_out"][m].T)
        w_out = w_out.at[(NM + m) * H:(NM + m + 1) * H, H:TWO_H].set(
            critic["w_out"][m].T)
    b_out = b_out.at[0:NM, 0:H].set(actor["b_out"])
    b_out = b_out.at[NM:TWO_NM, H:TWO_H].set(critic["b_out"])

    proj = jnp.zeros((TWO_H, OUT_W), jnp.float32)
    proj = proj.at[0:H, 0:H].set(jnp.eye(H, dtype=jnp.float32))   # actor pass-thru
    proj = proj.at[H:TWO_H, H:H + 1].set(params["critic_out_w"].T)  # critic head
    obias = jnp.zeros((1, OUT_W), jnp.float32).at[0, H].set(
        params["critic_out_b"][0])

    att_w = jnp.concatenate([actor["att_w"].T, critic["att_w"].T], axis=1)
    att_b = jnp.concatenate([actor["att_b"], critic["att_b"]])[None, :]
    gsum = jnp.zeros((TWO_NM, TWO_NM), jnp.float32)
    gsum = gsum.at[:NM, :NM].set(1.0).at[NM:, NM:].set(1.0)

    slab_b = jnp.zeros((rows_b, LW_B), jnp.float32)

    def put(slab, name, arr):
        r, c = arr.shape
        return slab.at[off_b[name]:off_b[name] + r, 0:c].set(arr)

    slab_b = put(slab_b, "w_out", w_out)
    slab_b = put(slab_b, "b_out", b_out)
    slab_b = put(slab_b, "proj", proj)
    slab_b = put(slab_b, "obias", obias)
    slab_b = put(slab_b, "att_w", att_w)
    slab_b = put(slab_b, "att_b", att_b)
    slab_b = put(slab_b, "gsum", gsum)

    return {"slab_a": slab_a, "slab_b": slab_b}


# ---------------------------------------------------------------------------
# Pure-JAX reference (directly mirrors the PyTorch module) for validation
# ---------------------------------------------------------------------------
def reference_forward(params, inputs, states, masks, *, phase_period,
                      time_scale, use_timestep):
    obs = inputs if use_timestep else inputs[:, :-1]
    step_count = jnp.round(inputs[:, -1] / time_scale).astype(jnp.int32)
    phase = jnp.mod(step_count, phase_period)
    onehot = jax.nn.one_hot(phase, phase_period, dtype=jnp.float32)

    def switch(p):
        sel = jax.nn.softmax(onehot @ p["att_w"].T + p["att_b"], axis=-1)
        h = jnp.tanh(jnp.einsum("bd,mhd->bmh", obs, p["w_in"]) + p["b_in"][None])
        o = jnp.einsum("bmh,mkh->bmk", h, p["w_out"]) + p["b_out"][None]
        return jnp.sum(sel[:, :, None] * o, axis=1)

    hc = switch(params["critic"])
    hc = jnp.tanh(hc) @ params["critic_out_w"].T + params["critic_out_b"]
    ha = jnp.tanh(switch(params["actor"]))
    return hc, ha, states


# ---------------------------------------------------------------------------
if __name__ == "__main__":
    # config (opt dict equivalent): soft switch, MLP modules with num_layer=2
    NUM_INPUTS = 9          # last column is the timestep
    HID_SZ = 32
    NUM_MODULES = 4
    PHASE_PERIOD = 4        # switch_sz == k in soft mode
    TIME_SCALE = 1.0
    USE_TIMESTEP = False    # obs = inputs[:, :-1]
    BATCH = 8

    key = jax.random.PRNGKey(0)
    k_params, k_obs = jax.random.split(key)
    params = init_model_params(k_params, NUM_INPUTS, HID_SZ, NUM_MODULES,
                               PHASE_PERIOD, USE_TIMESTEP)
    packed = pack_model_params(params, num_inputs=NUM_INPUTS,
                               use_timestep=USE_TIMESTEP)

    obs = jax.random.normal(k_obs, (BATCH, NUM_INPUTS - 1), jnp.float32)
    timestep = jnp.arange(BATCH, dtype=jnp.float32)[:, None] * TIME_SCALE
    inputs = jnp.concatenate([obs, timestep], axis=1)                 # [B, 9]
    states = jnp.zeros((BATCH, 1), jnp.float32)
    masks = jnp.ones((BATCH, 1), jnp.float32)

    forward = make_forward(num_inputs=NUM_INPUTS, hid_sz=HID_SZ,
                           num_modules=NUM_MODULES, phase_period=PHASE_PERIOD,
                           time_scale=TIME_SCALE, use_timestep=USE_TIMESTEP)
    fwd = jax.jit(forward)
    hidden_critic, hidden_actor, out_states = fwd(packed, inputs, states, masks)
    jax.block_until_ready((hidden_critic, hidden_actor, out_states))

    # validate against the plain-JAX reference of the PyTorch module
    hc_ref, ha_ref, _ = reference_forward(
        params, inputs, states, masks, phase_period=PHASE_PERIOD,
        time_scale=TIME_SCALE, use_timestep=USE_TIMESTEP)
    assert hidden_critic.shape == (BATCH, 1)
    assert hidden_actor.shape == (BATCH, HID_SZ)
    assert out_states.shape == (BATCH, 1)
    assert jnp.allclose(hidden_critic, hc_ref, atol=5e-3, rtol=5e-3)
    assert jnp.allclose(hidden_actor, ha_ref, atol=5e-3, rtol=5e-3)

    print("KERNEL_OK")
</pallas_src>

<mosaic_0001>
module attributes {stable_mosaic.version = 11 : i64} {
  func.func @kernel(%arg0: i32, %arg1: memref<8x9xf32, #tpu.memory_space<vmem>>, %arg2: memref<32x256xf32, #tpu.memory_space<vmem>>, %arg3: memref<360x128xf32, #tpu.memory_space<vmem>>, %arg4: memref<8x128xf32, #tpu.memory_space<vmem>>) attributes {dimension_semantics = [#tpu.dimension_semantics<parallel>], iteration_bounds = array<i64: 1>, scalar_prefetch = 0 : i64, scratch_operands = 0 : i64, tpu.core_type = #tpu.core_type<tc>, window_params = [{transform_indices = @transform_0, window_bounds = array<i64: 8, 9>}, {pipeline_mode = #tpu.pipeline_mode<synchronous>, transform_indices = @transform_1, window_bounds = array<i64: 32, 256>}, {pipeline_mode = #tpu.pipeline_mode<synchronous>, transform_indices = @transform_2, window_bounds = array<i64: 360, 128>}, {transform_indices = @transform_3, window_bounds = array<i64: 8, 128>}]} {
    %c0 = arith.constant 0 : index
    %c0_0 = arith.constant 0 : index
    %0 = vector.load %arg1[%c0, %c0_0] : memref<8x9xf32, #tpu.memory_space<vmem>>, vector<8x9xf32>
    %c0_1 = arith.constant 0 : index
    %c0_2 = arith.constant 0 : index
    %1 = vector.load %arg2[%c0_1, %c0_2] : memref<32x256xf32, #tpu.memory_space<vmem>>, vector<9x256xf32>
    %c16 = arith.constant 16 : index
    %c0_3 = arith.constant 0 : index
    %2 = vector.load %arg2[%c16, %c0_3] : memref<32x256xf32, #tpu.memory_space<vmem>>, vector<1x256xf32>
    %c24 = arith.constant 24 : index
    %c0_4 = arith.constant 0 : index
    %3 = vector.load %arg2[%c24, %c0_4] : memref<32x256xf32, #tpu.memory_space<vmem>>, vector<8x256xf32>
    %c0_5 = arith.constant 0 : index
    %c0_6 = arith.constant 0 : index
    %4 = vector.load %arg3[%c0_5, %c0_6] : memref<360x128xf32, #tpu.memory_space<vmem>>, vector<256x64xf32>
    %c256 = arith.constant 256 : index
    %c0_7 = arith.constant 0 : index
    %5 = vector.load %arg3[%c256, %c0_7] : memref<360x128xf32, #tpu.memory_space<vmem>>, vector<8x64xf32>
    %c264 = arith.constant 264 : index
    %c0_8 = arith.constant 0 : index
    %6 = vector.load %arg3[%c264, %c0_8] : memref<360x128xf32, #tpu.memory_space<vmem>>, vector<64x128xf32>
    %c328 = arith.constant 328 : index
    %c0_9 = arith.constant 0 : index
    %7 = vector.load %arg3[%c328, %c0_9] : memref<360x128xf32, #tpu.memory_space<vmem>>, vector<1x128xf32>
    %c336 = arith.constant 336 : index
    %c0_10 = arith.constant 0 : index
    %8 = vector.load %arg3[%c336, %c0_10] : memref<360x128xf32, #tpu.memory_space<vmem>>, vector<4x8xf32>
    %c344 = arith.constant 344 : index
    %c0_11 = arith.constant 0 : index
    %9 = vector.load %arg3[%c344, %c0_11] : memref<360x128xf32, #tpu.memory_space<vmem>>, vector<1x8xf32>
    %c352 = arith.constant 352 : index
    %c0_12 = arith.constant 0 : index
    %10 = vector.load %arg3[%c352, %c0_12] : memref<360x128xf32, #tpu.memory_space<vmem>>, vector<8x8xf32>
    %11 = vector.extract_strided_slice %0 {offsets = [0, 8], sizes = [8, 1], strides = [1, 1]} : vector<8x9xf32> to vector<8x1xf32>
    %cst = arith.constant 1.000000e+00 : f32
    %12 = vector.broadcast %cst : f32 to vector<8x1xf32>
    %13 = arith.divf %11, %12 : vector<8x1xf32>
    %cst_13 = arith.constant 5.000000e-01 : f32
    %14 = vector.broadcast %cst_13 : f32 to vector<8x1xf32>
    %15 = arith.addf %13, %14 : vector<8x1xf32>
    %16 = math.floor %15 : vector<8x1xf32>
    %cst_14 = arith.constant 4.000000e+00 : f32
    %17 = vector.broadcast %cst_14 : f32 to vector<8x1xf32>
    %18 = arith.divf %16, %17 : vector<8x1xf32>
    %19 = math.floor %18 : vector<8x1xf32>
    %cst_15 = arith.constant 4.000000e+00 : f32
    %20 = vector.broadcast %cst_15 : f32 to vector<8x1xf32>
    %21 = arith.mulf %20, %19 : vector<8x1xf32>
    %22 = arith.subf %16, %21 : vector<8x1xf32>
    %23 = arith.fptosi %22 : vector<8x1xf32> to vector<8x1xi32>
    %24 = tpu.iota {dimensions = array<i32: 1>} : vector<8x4xi32>
    %25 = vector.broadcast %23 : vector<8x1xi32> to vector<8x4xi32>
    %26 = arith.cmpi eq, %24, %25 : vector<8x4xi32>
    %27 = arith.extui %26 : vector<8x4xi1> to vector<8x4xi32>
    %28 = arith.sitofp %27 : vector<8x4xi32> to vector<8x4xf32>
    %cst_16 = arith.constant dense<0.000000e+00> : vector<8x8xf32>
    %29 = tpu.matmul %28, %8, %cst_16 {dimension_numbers = #tpu.dot_dimension_numbers<[1], [0], [0], [1], [0, 0, 1, 1], [], []>} : vector<8x4xf32>, vector<4x8xf32>, vector<8x8xf32> -> vector<8x8xf32>
    %30 = vector.broadcast %9 : vector<1x8xf32> to vector<8x8xf32>
    %31 = arith.addf %29, %30 : vector<8x8xf32>
    %cst_17 = arith.constant dense<0xFF800000> : vector<8xf32>
    %32 = vector.multi_reduction <maximumf>, %31, %cst_17 [1] : vector<8x8xf32> to vector<8xf32>
    %33 = vector.shape_cast %32 : vector<8xf32> to vector<8x1xf32>
    %34 = vector.broadcast %33 : vector<8x1xf32> to vector<8x8xf32>
    %35 = arith.subf %31, %34 : vector<8x8xf32>
    %36 = math.exp %35 : vector<8x8xf32>
    %cst_18 = arith.constant dense<0.000000e+00> : vector<8x8xf32>
    %37 = tpu.matmul %36, %10, %cst_18 {dimension_numbers = #tpu.dot_dimension_numbers<[1], [0], [0], [1], [0, 0, 1, 1], [], []>} : vector<8x8xf32>, vector<8x8xf32>, vector<8x8xf32> -> vector<8x8xf32>
    %38 = tpu.reciprocal %37 {approx = true} : vector<8x8xf32> -> vector<8x8xf32>
    %39 = arith.mulf %36, %38 : vector<8x8xf32>
    %cst_19 = arith.constant dense<0.000000e+00> : vector<8x256xf32>
    %40 = tpu.matmul %0, %1, %cst_19 {dimension_numbers = #tpu.dot_dimension_numbers<[1], [0], [0], [1], [0, 0, 1, 1], [], []>} : vector<8x9xf32>, vector<9x256xf32>, vector<8x256xf32> -> vector<8x256xf32>
    %41 = vector.broadcast %2 : vector<1x256xf32> to vector<8x256xf32>
    %42 = arith.addf %40, %41 : vector<8x256xf32>
    %43 = math.tanh %42 : vector<8x256xf32>
    %cst_20 = arith.constant dense<0.000000e+00> : vector<8x256xf32>
    %44 = tpu.matmul %39, %3, %cst_20 {dimension_numbers = #tpu.dot_dimension_numbers<[1], [0], [0], [1], [0, 0, 1, 1], [], []>} : vector<8x8xf32>, vector<8x256xf32>, vector<8x256xf32> -> vector<8x256xf32>
    %45 = arith.mulf %44, %43 : vector<8x256xf32>
    %cst_21 = arith.constant dense<0.000000e+00> : vector<8x64xf32>
    %46 = tpu.matmul %45, %4, %cst_21 {dimension_numbers = #tpu.dot_dimension_numbers<[1], [0], [0], [1], [0, 0, 1, 1], [], []>} : vector<8x256xf32>, vector<256x64xf32>, vector<8x64xf32> -> vector<8x64xf32>
    %cst_22 = arith.constant dense<0.000000e+00> : vector<8x64xf32>
    %47 = tpu.matmul %39, %5, %cst_22 {dimension_numbers = #tpu.dot_dimension_numbers<[1], [0], [0], [1], [0, 0, 1, 1], [], []>} : vector<8x8xf32>, vector<8x64xf32>, vector<8x64xf32> -> vector<8x64xf32>
    %48 = arith.addf %46, %47 : vector<8x64xf32>
    %49 = math.tanh %48 : vector<8x64xf32>
    %cst_23 = arith.constant dense<0.000000e+00> : vector<8x128xf32>
    %50 = tpu.matmul %49, %6, %cst_23 {dimension_numbers = #tpu.dot_dimension_numbers<[1], [0], [0], [1], [0, 0, 1, 1], [], []>} : vector<8x64xf32>, vector<64x128xf32>, vector<8x128xf32> -> vector<8x128xf32>
    %51 = vector.broadcast %7 : vector<1x128xf32> to vector<8x128xf32>
    %52 = arith.addf %50, %51 : vector<8x128xf32>
    %c0_24 = arith.constant 0 : index
    %c0_25 = arith.constant 0 : index
    %53 = vector.load %arg4[%c0_24, %c0_25] : memref<8x128xf32, #tpu.memory_space<vmem>>, vector<8x128xf32>
    tpu.vector_store %arg4[%c0_24, %c0_25], %52 {strides = array<i32>} : memref<8x128xf32, #tpu.memory_space<vmem>>, vector<8x128xf32>,
    return
  }
  func.func @transform_0(%arg0: i32) -> (i32, i32) {
    %c0_i32 = arith.constant 0 : i32
    %c0_i32_0 = arith.constant 0 : i32
    return %arg0, %c0_i32 : i32, i32
  }
  func.func @transform_1(%arg0: i32) -> (i32, i32) {
    %c0_i32 = arith.constant 0 : i32
    %c0_i32_0 = arith.constant 0 : i32
    %c0_i32_1 = arith.constant 0 : i32
    return %c0_i32, %c0_i32_0 : i32, i32
  }
  func.func @transform_2(%arg0: i32) -> (i32, i32) {
    %c0_i32 = arith.constant 0 : i32
    %c0_i32_0 = arith.constant 0 : i32
    %c0_i32_1 = arith.constant 0 : i32
    return %c0_i32, %c0_i32_0 : i32, i32
  }
  func.func @transform_3(%arg0: i32) -> (i32, i32) {
    %c0_i32 = arith.constant 0 : i32
    %c0_i32_0 = arith.constant 0 : i32
    return %arg0, %c0_i32 : i32, i32
  }
}

</mosaic_0001>

<bundles_post_ra>
// kernel: forward.1
= control target key start
LH: loop header
LB: loop body
LE: loop exit
PB: predicated region body
PF: predicated region fallthrough
CT: control target
= control target key end

     0   :  { %8 = vsyncpa [#allocation3], 0  ;;  %s937_s0 = inlined_call_operand.hbm [shape: f32[8,9], index: 0, kind: input, shape index: {}]   ;;  %s938_s1 = inlined_call_operand.hbm [shape: f32[32,256], index: 1, kind: input, shape index: {}]   ;;  %s939_s2 = inlined_call_operand.hbm [shape: f32[360,128], index: 2, kind: input, shape index: {}]   ;;  %s940_s3 = inlined_call_operand.vmem [shape: f32[8,128], index: 3, kind: output, shape index: {}]  }
   0x1   :  { %9 = vsyncpa [#allocation5], 0  ;;  %s867_s12 = smov [#allocation4]  }
   0x2   :  { %s25_s13 = sshll.u32 %s867_s12, 4  ;;  %s26_s13 = int_to_ptr.vmem [resolvable:$true] %s25_s13 }
   0x3   :  { %s811_s14 = scalar_lea.vmem %s26_s13, 1024  ;;  %p816_p1 = scmp.lt.s32.totalorder %s26_s13, %s26_s13 }
   0x4   :  { %p812_p0 = scmp.ne.s32.totalorder %s26_s13, %s811_s14  ;;  %p817_p2 = scmp.lt.s32.totalorder %s811_s14, %s811_s14 }
   0x6   :  { %p818_p3 = por %p817_p2, %p816_p1 }
   0x8   :  { %p819_p4 = pnand %p818_p3, %p812_p0 }
   0xa   :  { %822 = shalt.err (!%p819_p4)
}
   0xb   :  { %s868_s15 = smov 256   ;;  %s869_s16 = smov 16  }
   0xc   :  { %31 = dma.hbm_to_vmem [thread:$0]  %s938_s1, 1024, %s26_s13, [#allocation5], %s868_s15, %s868_s15, %s869_s16  }
   0xd   :  { %s870_s19 = smov [#allocation2]   ;;  %s871_s21 = smov [#allocation6]  }
   0xe   :  { %s16_s20 = sshll.u32 %s870_s19, 4  ;;  %s37_s22 = sshll.u32 %s871_s21, 4  ;;  %s17_s20 = int_to_ptr.vmem [resolvable:$true] %s16_s20  ;;  %s38_s22 = int_to_ptr.vmem [resolvable:$true] %s37_s22 }
   0xf   :  { %s831_s23 = scalar_lea.vmem %s17_s20, 128  ;;  %p836_p6 = scmp.lt.s32.totalorder %s17_s20, %s17_s20 }
  0x10   :  { %p832_p5 = scmp.ne.s32.totalorder %s17_s20, %s831_s23  ;;  %p837_p7 = scmp.lt.s32.totalorder %s831_s23, %s831_s23 }
  0x12   :  { %p838_p8 = por %p837_p7, %p836_p6 }
  0x14   :  { %p839_p9 = pnand %p838_p8, %p832_p5 }
  0x16   :  { %842 = shalt.err (!%p839_p9)
}
  0x17   :  { %19 = dma.hbm_to_vmem [thread:$0]  %s937_s0, 128, %s17_s20, [#allocation3]  }
  0x18   :  { %s851_s26 = scalar_lea.vmem %s38_s22, 5760  ;;  %p856_p11 = scmp.lt.s32.totalorder %s38_s22, %s38_s22 }
  0x19   :  { %p852_p10 = scmp.ne.s32.totalorder %s38_s22, %s851_s26  ;;  %p857_p12 = scmp.lt.s32.totalorder %s851_s26, %s851_s26 }
  0x1b   :  { %p858_p13 = por %p857_p12, %p856_p11 }
  0x1d   :  { %p859_p0 = pnand %p858_p13, %p852_p10 }
  0x1f   :  { %862 = shalt.err (!%p859_p0)
}
  0x20   :  { %s872_s1 = smov 128   ;;  %s873_s27 = smov 8  }
  0x21   :  { %43 = dma.hbm_to_vmem [thread:$0]  %s939_s2, 5760, %s38_s22, [#allocation5], %s872_s1, %s872_s1, %s873_s27  }
  0x22   :  { %863 = dma.done.wait [#allocation3], 128  }
  0x23   :  { %864 = vsyncadd [#allocation3], 4294967168 }
  0x24   :  { %865 = dma.done.wait [#allocation5], 6784  }
  0x25   :  { %866 = vsyncadd [#allocation5], 4294960512  ;;  %v874_v0 = vmov 8   ;;  %v875_v1 = vmov 0.0   ;;  %v53_v2 = vld [vmem:[#allocation2] sm:$0xff]  ;;  %vm131_vm0 = vcmask 1043456   ;;  %v115_v12 = vlaneseq }
  0x26   :  { %792 = vset.pattern.permute.xlu0 %v874_v0  ;;  %746 = vmatprep.subr.mxu0 %v875_v1  ;;  %v107_v3 = vadd.f32 0.5, %v53_v2  ;;  %v104_v10 = vld [vmem:[#allocation6 + $0x150] sm:$0xf]  ;;  %vm876_vm1 = vmmov 0   ;;  %vm127_vm2 = vcmask 31744   ;;  %vm205_vm4 = vcmask 64512  }
  0x27   :  { %449 = vmatprep.mubr.f32.mxu1 %v875_v1  ;;  %747 = vmatpush3.msk.msra.mxu0 %vm131_vm0, %v104_v10  ;;  %v116_v13 = vand.u32 127, %v115_v12  ;;  %v685_v16 = vld [vmem:[#allocation6 + $0x158] ss:$0 sm:$0xff]  ;;  %v106_v21 = vld [vmem:[#allocation6 + $0x160] sm:$0xff]  ;;  %vm302_vm5 = vcmask 1040384   ;;  %v55_v28 = vld [vmem:[#allocation4 + $0x8] sm:$0xff] }
  0x28   :  { %v108_v4 = vfloor.f32 %v107_v3  ;;  %748 = vmatprep.mubr.msk.f32.mxu0 %vm876_vm1, %v875_v1  ;;  %751 = vmatprep.subr.mxu0 %v875_v1  ;;  %v57_v22 = vld [vmem:[#allocation4 + $0x18] sm:$0x1]  ;;  %v56_v26 = vld [vmem:[#allocation4 + $0x10] sm:$0x1]  ;;  %v54_v29 = vld [vmem:[#allocation4] sm:$0xff]  ;;  %vm298_vm6 = vcmask 72704  }
  0x29   :  { %v61_v30 = vld [vmem:[#allocation4 + $0x38] sm:$0xff]  ;;  %v60_v31 = vld [vmem:[#allocation4 + $0x30] sm:$0xff]  ;;  %v94_v32 = vld [vmem:[#allocation6 + $0x100] sm:$0xff]  ;;  %vm603_vm7 = vcmask 523264  }
  0x2a   :  { %v110_v5 = vmul.f32 0.25, %v108_v4  ;;  %415 = vmatprep.subr.mxu1 %v61_v30  ;;  %v93_v33 = vld [vmem:[#allocation6 + $0xf8] sm:$0xff]  ;;  %v92_v39 = vld [vmem:[#allocation6 + $0xf0] sm:$0xff]  ;;  %v91_v41 = vld [vmem:[#allocation6 + $0xe8] sm:$0xff] }
  0x2b   :  { %416 = vmatpush1.msra.mxu1 %v60_v31  ;;  %v77_v38 = vld [vmem:[#allocation6 + $0x78] sm:$0xff]  ;;  %v76_v40 = vld [vmem:[#allocation6 + $0x70] sm:$0xff]  ;;  %v75_v42 = vld [vmem:[#allocation6 + $0x68] sm:$0xff] }
  0x2c   :  { %v111_v6 = vfloor.f32 %v110_v5  ;;  %702 = vmatprep.subr.mxu1 %v93_v33  ;;  %v90_v43 = vld [vmem:[#allocation6 + $0xe0] sm:$0xff]  ;;  %v89_v45 = vld [vmem:[#allocation6 + $0xd8] sm:$0xff]  ;;  %v88_v47 = vld [vmem:[#allocation6 + $0xd0] sm:$0xff] }
  0x2d   :  { %v74_v44 = vld [vmem:[#allocation6 + $0x60] sm:$0xff]  ;;  %v73_v46 = vld [vmem:[#allocation6 + $0x58] sm:$0xff]  ;;  %v72_v48 = vld [vmem:[#allocation6 + $0x50] sm:$0xff] }
  0x2e   :  { %v112_v7 = vmul.f32 4.0, %v111_v6  ;;  %v87_v49 = vld [vmem:[#allocation6 + $0xc8] sm:$0xff]  ;;  %v86_v51 = vld [vmem:[#allocation6 + $0xc0] sm:$0xff]  ;;  %v85_v53 = vld [vmem:[#allocation6 + $0xb8] sm:$0xff]  ;;  %v289_v6 = vshrl.u32 %v115_v12, 7 }
  0x2f   :  { %v71_v50 = vld [vmem:[#allocation6 + $0x48] sm:$0xff]  ;;  %v70_v52 = vld [vmem:[#allocation6 + $0x40] sm:$0xff]  ;;  %v69_v54 = vld [vmem:[#allocation6 + $0x38] sm:$0xff] }
  0x30   :  { %v113_v8 = vsub.f32 %v108_v4, %v112_v7  ;;  %v84_v55 = vld [vmem:[#allocation6 + $0xb0] sm:$0xff]  ;;  %v83_v57 = vld [vmem:[#allocation6 + $0xa8] sm:$0xff]  ;;  %v82_v59 = vld [vmem:[#allocation6 + $0xa0] sm:$0xff]  ;;  %v290_v7 = vsub.s32 0, %v289_v6 }
  0x31   :  { %v68_v56 = vld [vmem:[#allocation6 + $0x30] sm:$0xff]  ;;  %v67_v58 = vld [vmem:[#allocation6 + $0x28] sm:$0xff]  ;;  %v66_v60 = vld [vmem:[#allocation6 + $0x20] sm:$0xff] }
  0x32   :  { %v780_v9 = vtrunc.f32 %v113_v8  ;;  %v81_v61 = vld [vmem:[#allocation6 + $0x98] sm:$0xff]  ;;  %v80_v63 = vld [vmem:[#allocation6 + $0x90] sm:$0xff]  ;;  %v63_v3 = vld [vmem:[#allocation6 + $0x8] sm:$0xff] }
  0x33   :  { %v65_v62 = vld [vmem:[#allocation6 + $0x18] sm:$0xff]  ;;  %v64_v0 = vld [vmem:[#allocation6 + $0x10] sm:$0xff]  ;;  %v78_v4 = vld [vmem:[#allocation6 + $0x80] sm:$0xff] }
  0x34   :  { %v781_v11 = vcvt.f32.s32 %v780_v9  ;;  %v62_v5 = vld [vmem:[#allocation6] sm:$0xff]  ;;  %v294_v9 = vsub.s32 1, %v289_v6  ;;  %v96_v30 = vld [vmem:[#allocation6 + $0x110] sm:$0xff]  ;;  %v95_v31 = vld [vmem:[#allocation6 + $0x108] sm:$0xff] }
  0x35   :  { %v59_v8 = vld [vmem:[#allocation4 + $0x20] ss:$8 sm:$0x3] }
  0x36   :  { %118 = vperm.xlu0 %792, %v781_v11   ;;  %v291_v11 = vrot.slane %v59_v8, %v290_v7  ;;  %v102_v12 = vld [vmem:[#allocation6 + $0x140] sm:$0xff] }
  0xb1   :  { %v119_v14 = vpop.permute.xlu0 %118 }
  0xb2   :  { %vm120_vm3 = vcmp.eq.s32.totalorder %v116_v13, %v119_v14  ;;  %v295_v13 = vrot.slane %v59_v8, %v294_v9 }
  0xb3   :  { %v684_v15 = vsel %vm120_vm3, 1.0, %v875_v1 }
  0xb4   :  { %749 = vmatmul.mubr.msk.f32.vlgmr.msra.gmra.mxu0 %vm127_vm2, %v684_v15 }
  0xb5   :  { %753 = vmatprep.mubr.msk.f32.mxu0 %vm876_vm1, %v875_v1  ;;  %752 = vmatpush3.msra.mxu0 %v106_v21 }
  0xb6   :  { %689 = vmatprep.subr.msk.mxu0 %vm302_vm5, %v57_v22 }
 0x174   :  { %v201_v17 = vpop.f32.mrf.mxu0 }
 0x175   :  { %v202_v18 = vadd.f32 %v685_v16, %v201_v17 }
 0x176   :  { %v750_v19 = vpop.f32.mrf.mxu0 }
 0x177   :  { %v206_v20 = vsel %vm205_vm4, %v202_v18, -inf }
 0x178   :  { %207 = vmax.xlane.f32.xlu0 %v206_v20 }
 0x201   :  { %v208_v23 = vpop.xlane.xlu0 %207 }
 0x202   :  { %v209_v24 = vsub.f32 %v202_v18, %v208_v23 }
 0x204   :  { %v210_v25 = vmul.f32 1.442695, %v209_v24 }
 0x206   :  { %793 = vpow2.f32 %v210_v25  ;;  %v101_v25 = vld [vmem:[#allocation6 + $0x138] sm:$0xff] }
 0x213   :  { %v794_v27 = vpop.eup %793 }
 0x214   :  { %754 = vmatmul.mubr.msk.f32.vlgmr.msra.gmra.mxu0 %vm205_vm4, %v794_v27 }
 0x215   :  { %690 = vmatpush1.msk.msra.mxu0 %vm302_vm5, %v56_v26  ;;  %373 = vmatprep.mubr.f32.mxu0 %v875_v1  ;;  %v100_v26 = vld [vmem:[#allocation6 + $0x130] sm:$0xff] }
 0x216   :  { %339 = vmatprep.subr.mxu0 %v55_v28  ;;  %v98_v28 = vld [vmem:[#allocation6 + $0x120] sm:$0xff] }
 0x217   :  { %340 = vmatpush1.msra.mxu0 %v54_v29  ;;  %v97_v29 = vld [vmem:[#allocation6 + $0x118] sm:$0xff] }
 0x218   :  { %691 = vmatmul.mubr.msk.f32.vlgmr.msra.gmra.mxu0 %vm298_vm6, %v53_v2  ;;  %756 = vmatprep.subr.mxu0 %v875_v1  ;;  %v79_v2 = vld [vmem:[#allocation6 + $0x88] sm:$0xff] }
 0x219   :  { %758 = vmatprep.mubr.msk.f32.mxu0 %vm876_vm1, %v875_v1  ;;  %757 = vmatpush3.msra.mxu0 %v94_v32 }
 0x21a   :  { %761 = vmatprep.subr.mxu0 %v875_v1 }
 0x2d4   :  { %v281_v34 = vpop.f32.mrf.mxu0 }
 0x2d5   :  { %795 = vrcp.f32 %v281_v34 }
 0x2d6   :  { %v755_v35 = vpop.f32.mrf.mxu0 }
 0x2d8   :  { %v375_v10 = vpop.f32.mrf.mxu0 }
 0x2d9   :  { %v376_v15 = vadd.f32 %v375_v10, %v291_v11 }
 0x2da   :  { %v377_v14 = vpop.f32.mrf.mxu0 }
 0x2db   :  { %v378_v16 = vadd.f32 %v377_v14, %v295_v13  ;;  %797 = vtanh.f32 %v376_v15 }
 0x2dd   :  { %799 = vtanh.f32 %v378_v16 }
 0x2e2   :  { %v796_v36 = vpop.eup %795 }
 0x2e3   :  { %v286_v37 = vmul.f32 %v796_v36, %v794_v27  ;;  %v99_v27 = vld [vmem:[#allocation6 + $0x128] sm:$0xff] }
 0x2e5   :  { %692 = vmatmul.mubr.msk.f32.vlgmr.msra.gmra.mxu1 %vm205_vm4, %v286_v37  ;;  %759 = vmatmul.mubr.msk.f32.vlgmr.msra.gmra.mxu0 %vm205_vm4, %v286_v37  ;;  %v694_v37 = vld [vmem:[#allocation6 + $0x148] ss:$0 sm:$0xff] }
 0x2e6   :  { %703 = vmatpush3.msra.mxu1 %v77_v38  ;;  %777 = vmatprep.mubr.msk.f32.mxu0 %vm876_vm1, %v875_v1 }
 0x2e7   :  { %704 = vmatprep.subr.mxu1 %v92_v39  ;;  %762 = vmatpush3.msra.mxu0 %v102_v12 }
 0x2e8   :  { %705 = vmatpush3.msra.mxu1 %v76_v40  ;;  %v798_v19 = vpop.eup %797  ;;  %763 = vmatprep.subr.mxu0 %v875_v1 }
 0x2e9   :  { %706 = vmatprep.subr.mxu1 %v91_v41  ;;  %764 = vmatpush3.msra.mxu0 %v101_v25 }
 0x2ea   :  { %707 = vmatpush3.msra.mxu1 %v75_v42  ;;  %v800_v20 = vpop.eup %799  ;;  %765 = vmatprep.subr.mxu0 %v875_v1 }
 0x2eb   :  { %708 = vmatprep.subr.mxu1 %v90_v43  ;;  %766 = vmatpush3.msra.mxu0 %v100_v26 }
 0x2ec   :  { %709 = vmatpush3.msra.mxu1 %v74_v44  ;;  %767 = vmatprep.subr.mxu0 %v875_v1 }
 0x2ed   :  { %710 = vmatprep.subr.mxu1 %v89_v45  ;;  %768 = vmatpush3.msra.mxu0 %v99_v27 }
 0x2ee   :  { %711 = vmatpush3.msra.mxu1 %v73_v46  ;;  %769 = vmatprep.subr.mxu0 %v875_v1 }
 0x2ef   :  { %712 = vmatprep.subr.mxu1 %v88_v47  ;;  %770 = vmatpush3.msra.mxu0 %v98_v28 }
 0x2f0   :  { %713 = vmatpush3.msra.mxu1 %v72_v48  ;;  %771 = vmatprep.subr.mxu0 %v875_v1 }
 0x2f1   :  { %714 = vmatprep.subr.mxu1 %v87_v49  ;;  %772 = vmatpush3.msra.mxu0 %v97_v29 }
 0x2f2   :  { %715 = vmatpush3.msra.mxu1 %v71_v50  ;;  %773 = vmatprep.subr.mxu0 %v875_v1 }
 0x2f3   :  { %716 = vmatprep.subr.mxu1 %v86_v51  ;;  %774 = vmatpush3.msra.mxu0 %v96_v30 }
 0x2f4   :  { %717 = vmatpush3.msra.mxu1 %v70_v52  ;;  %775 = vmatprep.subr.mxu0 %v875_v1 }
 0x2f5   :  { %718 = vmatprep.subr.mxu1 %v85_v53  ;;  %776 = vmatpush3.msra.mxu0 %v95_v31 }
 0x2f6   :  { %719 = vmatpush3.msra.mxu1 %v69_v54 }
 0x2f7   :  { %720 = vmatprep.subr.mxu1 %v84_v55 }
 0x2f8   :  { %721 = vmatpush3.msra.mxu1 %v68_v56 }
 0x2f9   :  { %722 = vmatprep.subr.mxu1 %v83_v57 }
 0x2fa   :  { %723 = vmatpush3.msra.mxu1 %v67_v58 }
 0x2fb   :  { %724 = vmatprep.subr.mxu1 %v82_v59 }
 0x2fc   :  { %725 = vmatpush3.msra.mxu1 %v66_v60 }
 0x2fd   :  { %726 = vmatprep.subr.mxu1 %v81_v61 }
 0x2fe   :  { %727 = vmatpush3.msra.mxu1 %v65_v62 }
 0x2ff   :  { %728 = vmatprep.subr.mxu1 %v80_v63 }
 0x300   :  { %729 = vmatpush3.msra.mxu1 %v64_v0 }
 0x301   :  { %730 = vmatprep.subr.mxu1 %v79_v2 }
 0x302   :  { %731 = vmatpush3.msra.mxu1 %v63_v3 }
 0x303   :  { %732 = vmatprep.subr.mxu1 %v78_v4 }
 0x304   :  { %733 = vmatpush3.msra.mxu1 %v62_v5 }
 0x3a5   :  { %v451_v17 = vpop.f32.mrf.mxu1  ;;  %v524_v18 = vpop.f32.mrf.mxu0 }
 0x3a6   :  { %v456_v24 = vmul.f32 %v798_v19, %v451_v17 }
 0x3a7   :  { %v453_v21 = vpop.f32.mrf.mxu1  ;;  %v760_v22 = vpop.f32.mrf.mxu0 }
 0x3a8   :  { %v457_v23 = vmul.f32 %v800_v20, %v453_v21 }
 0x3aa   :  { %592 = vmatprep.mubr.f32.mxu1 %v457_v23 }
 0x3ab   :  { %593 = vmatmul.mubr.f32.vlgmr.msra.gmra.mxu1 %v456_v24 }
 0x46b   :  { %v734_v32 = vpop.f32.mrf.mxu1 }
 0x46d   :  { %v735_v33 = vpop.f32.mrf.mxu1 }
 0x46e   :  { %v736_v34 = vadd.f32 %v735_v33, %v734_v32 }
 0x470   :  { %v595_v35 = vadd.f32 %v736_v34, %v524_v18 }
 0x472   :  { %801 = vtanh.f32 %v595_v35 }
 0x47f   :  { %v802_v36 = vpop.eup %801 }
 0x480   :  { %778 = vmatmul.mubr.msk.f32.vlgmr.msra.gmra.mxu0 %vm603_vm7, %v802_v36 }
 0x540   :  { %v673_v38 = vpop.f32.mrf.mxu0 }
 0x541   :  { %v674_v39 = vadd.f32 %v694_v37, %v673_v38 }
 0x542   :  { %v779_v40 = vpop.f32.mrf.mxu0 }
 0x543   :  { %677 = vst [vmem:[%s940_s3] sm:$0xff] %v674_v39 }
 0x544   :  { %682 = vsyncpa [#allocation3], 1 }
 0x545   :  { %683 = vsyncpa [#allocation5], 1 }

</bundles_post_ra>
